<compile_context>
chip_gen: v6e
topology: v6e:2x2x1
jax: 0.10.0
libtpu: 0.0.40
codegen_flags: <defaults>
</compile_context>

<pallas_src>
import jax
import jax.numpy as jnp
from jax import lax
from jax.experimental import pallas as pl
from jax.experimental.pallas import tpu as pltpu

LANES = 128
BLOCK_BYTES = 2 * 1024 * 1024        # ~2 MiB per input per pipeline buffer
MAX_FALLBACK_LANE = 4096             # widest non-128 lane dim tiled without padding
VMEM_LIMIT_BYTES = 32 * 1024 * 1024  # safe on v5e (128 MiB), v6e (128), v7x (64)


def _cdiv(a, b):
    return -(-a // b)


def _round_down_mult(x, m):
    return max(m, (x // m) * m)


def _num_tc_splits():
    """2-way split only on multi-TensorCore chips (v7x); 1 on v5e/v6e."""
    try:
        kind = jax.devices()[0].device_kind.lower()
    except Exception:
        return 1
    return 2 if "v7" in kind else 1


def _slab_shape(shape):
    """Lane-dense 2-D view of `shape`, chosen so the reshape is free (no copy)."""
    n = 1
    for d in shape:
        n *= int(d)
    if n % LANES == 0:
        return (n // LANES, LANES), False
    last = int(shape[-1]) if len(shape) else 1
    if last <= MAX_FALLBACK_LANE:
        return (n // last, last), False          # collapse leading dims: free
    # TODO(synk): very wide, non-128-divisible last dim -> pad (extra HBM pass).
    return (_cdiv(n, LANES), LANES), True


def _to_slab(x, slab_shape, needs_pad):
    if not needs_pad:
        return jnp.reshape(x, slab_shape)
    flat = jnp.ravel(x)
    pad = slab_shape[0] * slab_shape[1] - flat.shape[0]
    return jnp.pad(flat, (0, pad)).reshape(slab_shape)


def _make_rmse_kernel(tile_r, lane_w, tiles_per_split, valid_rows, full_tiles,
                      needs_edge_mask, has_mask):
    """Partial-sum kernel for one (tile_r, grid, mask) configuration."""

    def kernel(*refs):
        if has_mask:
            fake_ref, real_ref, mask_ref, sq_ref, msum_ref = refs
        else:
            fake_ref, real_ref, sq_ref = refs
            mask_ref = msum_ref = None

        p = pl.program_id(0)   # split axis (CORE_PARALLEL on v7x, size 1 else)
        j = pl.program_id(1)   # reduction (arbitrary) axis

        @pl.when(j == 0)
        def _init():
            sq_ref[...] = jnp.zeros_like(sq_ref)
            if has_mask:
                msum_ref[...] = jnp.zeros_like(msum_ref)

        def accumulate(valid):
            # Upcast per-block inside the kernel; HBM streams stay native dtype.
            diff = (real_ref[...].astype(jnp.float32)
                    - fake_ref[...].astype(jnp.float32))
            if has_mask:
                m = mask_ref[...].astype(jnp.float32)
                diff = m * diff
                if valid is not None:
                    m = jnp.where(valid, m, 0.0)         # where(): NaN-safe
            if valid is not None:
                diff = jnp.where(valid, diff, 0.0)
            # Sublane-only partial reduce; cross-lane reduce deferred to wrapper.
            sq_ref[...] += jnp.sum(diff * diff, axis=0).reshape(1, 1, lane_w)
            if has_mask:
                msum_ref[...] += jnp.sum(m, axis=0).reshape(1, 1, lane_w)

        if not needs_edge_mask:
            accumulate(None)
        else:
            # Logical (unclamped) tile id; tiles past `full_tiles` may contain
            # ragged garbage or be duplicated by the clamped index map.
            t = p * tiles_per_split + j

            @pl.when(t < full_tiles)
            def _full():
                accumulate(None)

            @pl.when(t >= full_tiles)
            def _edge():
                row = t * tile_r + lax.broadcasted_iota(
                    jnp.int32, (tile_r, lane_w), 0)
                accumulate(row < valid_rows)

    return kernel


_FLOAT_STREAM = (jnp.dtype(jnp.float32), jnp.dtype(jnp.bfloat16),
                 jnp.dtype(jnp.float16))
_MASK_STREAM = _FLOAT_STREAM + (jnp.dtype(jnp.int8), jnp.dtype(jnp.uint8),
                                jnp.dtype(jnp.int32))


@jax.jit
def rmse_pallas(fake, real, mask=None):
    """sqrt( sum(|mask*(real-fake)|^2) / (sum(mask)+1e-6) )."""
    if fake.shape != real.shape:
        # Glue: bilinear resize of fake to real's spatial size (NCHW).
        _, _, H, W = real.shape
        fake = jax.image.resize(fake, fake.shape[:2] + (H, W),
                                method="bilinear")

    # --- native-dtype streaming (no wrapper-side promotion) ------------------
    if jnp.dtype(fake.dtype) not in _FLOAT_STREAM:
        fake = fake.astype(jnp.float32)
    if jnp.dtype(real.dtype) not in _FLOAT_STREAM:
        real = real.astype(jnp.float32)

    has_mask = mask is not None
    if has_mask:
        mdt = jnp.dtype(mask.dtype)
        if mdt == jnp.dtype(jnp.bool_):
            mask = mask.astype(jnp.int8)          # 1-byte mask stream
        elif mdt not in _MASK_STREAM:
            mask = mask.astype(jnp.float32)

    # --- free lane-dense slab views ------------------------------------------
    slab_shape, needs_pad = _slab_shape(real.shape)
    rows, lane_w = slab_shape
    inputs = [_to_slab(fake, slab_shape, needs_pad),
              _to_slab(real, slab_shape, needs_pad)]
    if has_mask:
        inputs.append(_to_slab(mask, slab_shape, needs_pad))

    # --- tiling ---------------------------------------------------------------
    max_item = max(jnp.dtype(x.dtype).itemsize for x in inputs)
    budget_rows = _round_down_mult(BLOCK_BYTES // (lane_w * max_item), 32)
    tile_r = rows if rows <= budget_rows else budget_rows
    tiles_total = _cdiv(rows, tile_r)

    num_splits = _num_tc_splits()
    if tiles_total < num_splits:
        num_splits = 1
    tps = _cdiv(tiles_total, num_splits)                 # tiles per split
    full_tiles = rows // tile_r                          # fully-valid tiles
    needs_edge_mask = (num_splits * tps * tile_r) > rows

    if num_splits * tps == tiles_total:
        def in_map(p, j):
            return (p * tps + j, 0)
    else:
        last_tile = tiles_total - 1

        def in_map(p, j):
            # Clamp duplicated trailing tiles onto the last real block; their
            # contribution is zeroed in-kernel via the logical row mask.
            return (jnp.minimum(p * tps + j, last_tile), 0)

    in_spec = pl.BlockSpec((tile_r, lane_w), in_map)
    out_spec = pl.BlockSpec((1, 1, lane_w), lambda p, j: (p, 0, 0))
    out_sds = jax.ShapeDtypeStruct((num_splits, 1, lane_w), jnp.float32)

    if num_splits > 1:
        dims = (pltpu.CORE_PARALLEL, pltpu.ARBITRARY)    # shard across v7x TCs
    else:
        dims = ("arbitrary", "arbitrary")

    bytes_accessed = sum(int(x.size) * jnp.dtype(x.dtype).itemsize
                         for x in inputs)
    cost = pl.CostEstimate(flops=5 * int(inputs[1].size), transcendentals=0,
                           bytes_accessed=int(bytes_accessed))

    kernel = _make_rmse_kernel(tile_r, lane_w, tps, rows, full_tiles,
                               needs_edge_mask, has_mask)

    call = pl.pallas_call(
        kernel,
        out_shape=(out_sds, out_sds) if has_mask else out_sds,
        grid_spec=pltpu.PrefetchScalarGridSpec(
            num_scalar_prefetch=0,
            grid=(num_splits, tps),
            in_specs=[in_spec] * len(inputs),
            out_specs=(out_spec, out_spec) if has_mask else out_spec,
        ),
        compiler_params=pltpu.CompilerParams(
            dimension_semantics=dims,
            vmem_limit_bytes=VMEM_LIMIT_BYTES,
        ),
        cost_estimate=cost,
    )

    # Epilogue (tiny): cross-lane + cross-split reduce, divide, sqrt.
    if has_mask:
        sq_part, m_part = call(*inputs)
        denom = jnp.sum(m_part) + 1e-6
    else:
        sq_part = call(*inputs)
        denom = float(real.size) + 1e-6            # sum(ones) is static
    return jnp.sqrt(jnp.sum(sq_part) / denom)


def rmse_ref(fake, real, mask=None):
    if fake.shape != real.shape:
        _, _, H, W = real.shape
        fake = jax.image.resize(fake, fake.shape[:2] + (H, W),
                                method="bilinear")
    fake = fake.astype(jnp.float32)
    real = real.astype(jnp.float32)
    if mask is None:
        mask = jnp.ones(real.shape, jnp.float32)
    mask = mask.astype(jnp.float32)
    diff = mask * (real - fake)
    return jnp.sqrt(jnp.sum(jnp.abs(diff) ** 2) / (jnp.sum(mask) + 1e-6))


if __name__ == "__main__":
    key = jax.random.PRNGKey(0)

    def run_case(idx, fshape, rshape, fdtype=jnp.float32, mask_kind="float"):
        k1, k2, k3 = jax.random.split(jax.random.fold_in(key, idx), 3)
        fake = jax.random.normal(k1, fshape, dtype=jnp.float32).astype(fdtype)
        real = jax.random.normal(k2, rshape, dtype=jnp.float32).astype(fdtype)
        if mask_kind == "none":
            mask = None
        elif mask_kind == "bool":
            mask = jax.random.uniform(k3, rshape) > 0.5
        else:
            mask = (jax.random.uniform(k3, rshape) > 0.5).astype(jnp.float32)
        got = jax.block_until_ready(rmse_pallas(fake, real, mask))
        want = jax.block_until_ready(rmse_ref(fake, real, mask))
        rtol = 1e-4 if fdtype == jnp.float32 else 5e-3
        assert jnp.allclose(got, want, rtol=rtol, atol=1e-6), \
            (idx, fshape, got, want)

    run_case(0, (2, 4, 16, 16), (2, 4, 16, 16))                      # single tile
    run_case(1, (2, 4, 8, 8), (2, 4, 16, 16))                        # bilinear upsample
    run_case(2, (2, 3, 10, 13), (2, 3, 10, 13))                      # numel % 128 != 0 (free reshape, no pad)
    run_case(3, (2, 4, 144, 512), (2, 4, 144, 512))                  # multi-tile + ragged edge tile
    run_case(4, (2, 4, 144, 512), (2, 4, 144, 512), mask_kind="none")# no-mask kernel variant
    run_case(5, (2, 4, 72, 512), (2, 4, 72, 512), fdtype=jnp.bfloat16)  # native bf16 stream + f32 mask
    run_case(6, (2, 4, 16, 16), (2, 4, 16, 16), mask_kind="bool")    # int8 mask stream

    print("KERNEL_OK")
</pallas_src>

<mosaic_0001>
module attributes {stable_mosaic.version = 11 : i64} {
  func.func @kernel(%arg0: i32, %arg1: i32, %arg2: memref<16x128xf32, #tpu.memory_space<vmem>>, %arg3: memref<16x128xf32, #tpu.memory_space<vmem>>, %arg4: memref<16x128xf32, #tpu.memory_space<vmem>>, %arg5: memref<1x1x128xf32, #tpu.memory_space<vmem>>, %arg6: memref<1x1x128xf32, #tpu.memory_space<vmem>>) attributes {dimension_semantics = [#tpu.dimension_semantics<arbitrary>, #tpu.dimension_semantics<arbitrary>], iteration_bounds = array<i64: 1, 1>, scalar_prefetch = 0 : i64, scratch_operands = 0 : i64, tpu.core_type = #tpu.core_type<tc>, window_params = [{transform_indices = @transform_0, window_bounds = array<i64: 16, 128>}, {transform_indices = @transform_1, window_bounds = array<i64: 16, 128>}, {transform_indices = @transform_2, window_bounds = array<i64: 16, 128>}, {transform_indices = @transform_3, window_bounds = array<i64: 1, 1, 128>}, {transform_indices = @transform_4, window_bounds = array<i64: 1, 1, 128>}]} {
    %c0_i32 = arith.constant 0 : i32
    %0 = arith.cmpi eq, %arg1, %c0_i32 : i32
    %1 = arith.extui %0 : i1 to i32
    %c0_i32_0 = arith.constant 0 : i32
    %2 = arith.cmpi ne, %1, %c0_i32_0 : i32
    scf.if %2 {
      %cst_19 = arith.constant 0.000000e+00 : f32
      %19 = vector.broadcast %cst_19 : f32 to vector<1x1x128xf32>
      %c0_20 = arith.constant 0 : index
      %c0_21 = arith.constant 0 : index
      %c0_22 = arith.constant 0 : index
      %20 = vector.load %arg5[%c0_20, %c0_21, %c0_22] : memref<1x1x128xf32, #tpu.memory_space<vmem>>, vector<1x1x128xf32>
      tpu.vector_store %arg5[%c0_20, %c0_21, %c0_22], %19 {strides = array<i32>} : memref<1x1x128xf32, #tpu.memory_space<vmem>>, vector<1x1x128xf32>,
      %cst_23 = arith.constant 0.000000e+00 : f32
      %21 = vector.broadcast %cst_23 : f32 to vector<1x1x128xf32>
      %c0_24 = arith.constant 0 : index
      %c0_25 = arith.constant 0 : index
      %c0_26 = arith.constant 0 : index
      %22 = vector.load %arg6[%c0_24, %c0_25, %c0_26] : memref<1x1x128xf32, #tpu.memory_space<vmem>>, vector<1x1x128xf32>
      tpu.vector_store %arg6[%c0_24, %c0_25, %c0_26], %21 {strides = array<i32>} : memref<1x1x128xf32, #tpu.memory_space<vmem>>, vector<1x1x128xf32>,
    } else {
    }
    %c0 = arith.constant 0 : index
    %c0_1 = arith.constant 0 : index
    %3 = vector.load %arg3[%c0, %c0_1] : memref<16x128xf32, #tpu.memory_space<vmem>>, vector<16x128xf32>
    %c0_2 = arith.constant 0 : index
    %c0_3 = arith.constant 0 : index
    %4 = vector.load %arg2[%c0_2, %c0_3] : memref<16x128xf32, #tpu.memory_space<vmem>>, vector<16x128xf32>
    %5 = arith.subf %3, %4 : vector<16x128xf32>
    %c0_4 = arith.constant 0 : index
    %c0_5 = arith.constant 0 : index
    %6 = vector.load %arg4[%c0_4, %c0_5] : memref<16x128xf32, #tpu.memory_space<vmem>>, vector<16x128xf32>
    %7 = arith.mulf %6, %5 : vector<16x128xf32>
    %c0_6 = arith.constant 0 : index
    %c0_7 = arith.constant 0 : index
    %c0_8 = arith.constant 0 : index
    %8 = vector.load %arg5[%c0_6, %c0_7, %c0_8] : memref<1x1x128xf32, #tpu.memory_space<vmem>>, vector<1x1x128xf32>
    %9 = arith.mulf %7, %7 : vector<16x128xf32>
    %cst = arith.constant dense<0.000000e+00> : vector<128xf32>
    %10 = vector.multi_reduction <add>, %9, %cst [0] : vector<16x128xf32> to vector<128xf32>
    %11 = vector.shape_cast %10 : vector<128xf32> to vector<1x1x128xf32>
    %12 = arith.addf %8, %11 : vector<1x1x128xf32>
    %c0_9 = arith.constant 0 : index
    %c0_10 = arith.constant 0 : index
    %c0_11 = arith.constant 0 : index
    %13 = vector.load %arg5[%c0_9, %c0_10, %c0_11] : memref<1x1x128xf32, #tpu.memory_space<vmem>>, vector<1x1x128xf32>
    tpu.vector_store %arg5[%c0_9, %c0_10, %c0_11], %12 {strides = array<i32>} : memref<1x1x128xf32, #tpu.memory_space<vmem>>, vector<1x1x128xf32>,
    %c0_12 = arith.constant 0 : index
    %c0_13 = arith.constant 0 : index
    %c0_14 = arith.constant 0 : index
    %14 = vector.load %arg6[%c0_12, %c0_13, %c0_14] : memref<1x1x128xf32, #tpu.memory_space<vmem>>, vector<1x1x128xf32>
    %cst_15 = arith.constant dense<0.000000e+00> : vector<128xf32>
    %15 = vector.multi_reduction <add>, %6, %cst_15 [0] : vector<16x128xf32> to vector<128xf32>
    %16 = vector.shape_cast %15 : vector<128xf32> to vector<1x1x128xf32>
    %17 = arith.addf %14, %16 : vector<1x1x128xf32>
    %c0_16 = arith.constant 0 : index
    %c0_17 = arith.constant 0 : index
    %c0_18 = arith.constant 0 : index
    %18 = vector.load %arg6[%c0_16, %c0_17, %c0_18] : memref<1x1x128xf32, #tpu.memory_space<vmem>>, vector<1x1x128xf32>
    tpu.vector_store %arg6[%c0_16, %c0_17, %c0_18], %17 {strides = array<i32>} : memref<1x1x128xf32, #tpu.memory_space<vmem>>, vector<1x1x128xf32>,
    return
  }
  func.func @transform_0(%arg0: i32, %arg1: i32) -> (i32, i32) {
    %c1_i32 = arith.constant 1 : i32
    %0 = arith.muli %arg0, %c1_i32 : i32
    %1 = arith.addi %0, %arg1 : i32
    %c0_i32 = arith.constant 0 : i32
    %c0_i32_0 = arith.constant 0 : i32
    return %1, %c0_i32 : i32, i32
  }
  func.func @transform_1(%arg0: i32, %arg1: i32) -> (i32, i32) {
    %c1_i32 = arith.constant 1 : i32
    %0 = arith.muli %arg0, %c1_i32 : i32
    %1 = arith.addi %0, %arg1 : i32
    %c0_i32 = arith.constant 0 : i32
    %c0_i32_0 = arith.constant 0 : i32
    return %1, %c0_i32 : i32, i32
  }
  func.func @transform_2(%arg0: i32, %arg1: i32) -> (i32, i32) {
    %c1_i32 = arith.constant 1 : i32
    %0 = arith.muli %arg0, %c1_i32 : i32
    %1 = arith.addi %0, %arg1 : i32
    %c0_i32 = arith.constant 0 : i32
    %c0_i32_0 = arith.constant 0 : i32
    return %1, %c0_i32 : i32, i32
  }
  func.func @transform_3(%arg0: i32, %arg1: i32) -> (i32, i32, i32) {
    %c0_i32 = arith.constant 0 : i32
    %c0_i32_0 = arith.constant 0 : i32
    %c0_i32_1 = arith.constant 0 : i32
    return %arg0, %c0_i32, %c0_i32_0 : i32, i32, i32
  }
  func.func @transform_4(%arg0: i32, %arg1: i32) -> (i32, i32, i32) {
    %c0_i32 = arith.constant 0 : i32
    %c0_i32_0 = arith.constant 0 : i32
    %c0_i32_1 = arith.constant 0 : i32
    return %arg0, %c0_i32, %c0_i32_0 : i32, i32, i32
  }
}

</mosaic_0001>

<bundles_post_ra>
// kernel: rmse_pallas.1
= control target key start
LH: loop header
LB: loop body
LE: loop exit
PB: predicated region body
PF: predicated region fallthrough
CT: control target
= control target key end

     0   :  { %v147_v0 = vmov 0.0   ;;  %s209_s3 = inlined_call_operand.vmem [shape: f32[1,1,128], index: 3, kind: output, shape index: {0}]   ;;  %s210_s4 = inlined_call_operand.vmem [shape: f32[1,1,128], index: 4, kind: output, shape index: {1}]   ;;  %s211_s0 = inlined_call_operand.vmem [shape: f32[16,128], index: 0, kind: input, shape index: {}]   ;;  %s212_s1 = inlined_call_operand.vmem [shape: f32[16,128], index: 1, kind: input, shape index: {}]   ;;  %s213_s2 = inlined_call_operand.vmem [shape: f32[16,128], index: 2, kind: input, shape index: {}]  }
   0x1   :  { %86 = vst [vmem:[%s209_s3] sm:$0x1] %v147_v0  ;;  %87 = vst [vmem:[%s210_s4] sm:$0x1] %v147_v0  ;;  %v88_v1 = vld [vmem:[%s212_s1] sm:$0xff]  ;;  %v89_v2 = vld [vmem:[%s212_s1 + $0x8] sm:$0xff] }
   0x2   :  { %v90_v3 = vld [vmem:[%s211_s0] sm:$0xff]  ;;  %v91_v4 = vld [vmem:[%s211_s0 + $0x8] sm:$0xff] }
   0x3   :  { %v92_v5 = vsub.f32 %v88_v1, %v90_v3  ;;  %v94_v6 = vld [vmem:[%s213_s2] sm:$0xff]  ;;  %v95_v7 = vld [vmem:[%s213_s2 + $0x8] sm:$0xff]  ;;  %v93_v8 = vsub.f32 %v89_v2, %v91_v4 }
   0x4   :  { %v111_v9 = vadd.f32 %v95_v7, %v94_v6 }
   0x5   :  { %v96_v10 = vmul.f32 %v94_v6, %v92_v5  ;;  %v97_v11 = vmul.f32 %v95_v7, %v93_v8 }
   0x6   :  { %v112_v12 = vrot.slane %v111_v9, 4 }
   0x7   :  { %v99_v13 = vmul.f32 %v96_v10, %v96_v10  ;;  %v100_v14 = vmul.f32 %v97_v11, %v97_v11 }
   0x8   :  { %v113_v15 = vadd.f32 %v112_v12, %v111_v9  ;;  %v110_v22 = vld [vmem:[%s210_s4] sm:$0x1] }
   0x9   :  { %v101_v16 = vadd.f32 %v100_v14, %v99_v13  ;;  %v98_v28 = vld [vmem:[%s209_s3] sm:$0x1] }
   0xa   :  { %v114_v17 = vrot.slane %v113_v15, 2 }
   0xb   :  { %v102_v18 = vrot.slane %v101_v16, 4 }
   0xc   :  { %v115_v19 = vadd.f32 %v114_v17, %v113_v15 }
   0xd   :  { %v103_v20 = vadd.f32 %v102_v18, %v101_v16 }
   0xe   :  { %v116_v21 = vrot.slane %v115_v19, 1 }
   0xf   :  { %v104_v23 = vrot.slane %v103_v20, 2 }
  0x10   :  { %v117_v24 = vadd.f32 %v116_v21, %v115_v19 }
  0x11   :  { %v105_v25 = vadd.f32 %v104_v23, %v103_v20 }
  0x12   :  { %v118_v26 = vadd.f32 %v117_v24, %v110_v22 }
  0x13   :  { %v106_v27 = vrot.slane %v105_v25, 1 }
  0x14   :  { %119 = vst [vmem:[%s210_s4] sm:$0x1] %v118_v26 }
  0x15   :  { %v107_v29 = vadd.f32 %v106_v27, %v105_v25 }
  0x17   :  { %v108_v30 = vadd.f32 %v107_v29, %v98_v28 }
  0x19   :  { %109 = vst [vmem:[%s209_s3] sm:$0x1] %v108_v30 }

</bundles_post_ra>
